<compile_context>
chip_gen: v7x
topology: tpu7x:2x2x1
jax: 0.10.0
libtpu: 0.0.40
codegen_flags: <defaults>
</compile_context>

<pallas_src>
import functools

import jax
import jax.numpy as jnp
from jax.experimental import pallas as pl
from jax.experimental.pallas import tpu as pltpu


def _round_up(x: int, m: int) -> int:
    return ((x + m - 1) // m) * m


def _qnetwork_kernel(x_ref, w0_ref, b0_ref, w1_ref, b1_ref, w2_ref, b2_ref, o_ref):
    """Fused 3-layer MLP: relu(relu(x @ W0 + b0) @ W1 + b1) @ W2 + b2.

    Weights arrive as bf16 (MXU-native), biases as f32.  All matmuls accumulate in f32
    on the MXU; bias-add / ReLU run on the VPU in f32.
    """
    x = x_ref[...].astype(jnp.bfloat16)

    # linear_0 + relu_0
    h0 = jnp.dot(x, w0_ref[...], preferred_element_type=jnp.float32) + b0_ref[...]
    h0 = jnp.maximum(h0, 0.0).astype(jnp.bfloat16)

    # linear_1 + relu_1
    h1 = jnp.dot(h0, w1_ref[...], preferred_element_type=jnp.float32) + b1_ref[...]
    h1 = jnp.maximum(h1, 0.0).astype(jnp.bfloat16)

    # linear_2 (no activation)
    out = jnp.dot(h1, w2_ref[...], preferred_element_type=jnp.float32) + b2_ref[...]
    o_ref[...] = out.astype(o_ref.dtype)


@functools.partial(jax.jit, static_argnames=("block_batch",))
def qnetwork_forward(x, w0, b0, w1, b1, w2, b2, *, block_batch=2048):
    batch, state_size = x.shape
    hidden0 = w0.shape[1]
    hidden1 = w1.shape[1]
    action_size = w2.shape[1]

    # Batch tile: multiple of 8 (sublane granularity), capped by block_batch.
    tb = min(block_batch, _round_up(batch, 8))
    padded_batch = _round_up(batch, tb)
    if padded_batch != batch:
        x = jnp.pad(x, ((0, padded_batch - batch), (0, 0)))
    num_blocks = padded_batch // tb

    # bf16 operands for the MXU; f32 biases for the VPU epilogue.
    w0b = w0.astype(jnp.bfloat16)
    w1b = w1.astype(jnp.bfloat16)
    w2b = w2.astype(jnp.bfloat16)
    b0f = b0.astype(jnp.float32)
    b1f = b1.astype(jnp.float32)
    b2f = b2.astype(jnp.float32)

    flops = 2 * padded_batch * (
        state_size * hidden0 + hidden0 * hidden1 + hidden1 * action_size
    )
    weight_bytes = 2 * (state_size * hidden0 + hidden0 * hidden1 + hidden1 * action_size)
    bias_bytes = 4 * (hidden0 + hidden1 + action_size)
    bytes_accessed = (
        padded_batch * state_size * x.dtype.itemsize      # read x
        + padded_batch * action_size * 4                   # write out (f32)
        + weight_bytes + bias_bytes                         # resident params, read once
    )

    grid_spec = pltpu.PrefetchScalarGridSpec(
        num_scalar_prefetch=0,
        grid=(num_blocks,),
        in_specs=[
            # Batch-tiled input: new block each grid step (double-buffered DMA).
            pl.BlockSpec((tb, state_size), lambda i: (i, 0)),
            # Weights / biases: constant block index -> loaded once, resident in VMEM.
            pl.BlockSpec(w0b.shape, lambda i: (0, 0)),
            pl.BlockSpec(b0f.shape, lambda i: (0, 0)),
            pl.BlockSpec(w1b.shape, lambda i: (0, 0)),
            pl.BlockSpec(b1f.shape, lambda i: (0, 0)),
            pl.BlockSpec(w2b.shape, lambda i: (0, 0)),
            pl.BlockSpec(b2f.shape, lambda i: (0, 0)),
        ],
        out_specs=pl.BlockSpec((tb, action_size), lambda i: (i, 0)),
    )

    out = pl.pallas_call(
        _qnetwork_kernel,
        out_shape=jax.ShapeDtypeStruct((padded_batch, action_size), jnp.float32),
        grid_spec=grid_spec,
        compiler_params=pltpu.CompilerParams(
            # Batch tiles are independent -> shard across v7x's two TensorCores.
            dimension_semantics=("parallel",),
            # Explicit VMEM budget with headroom; safe on v5e/v6e (128 MiB) and
            # v7x (64 MiB physical); this kernel needs only a few MiB.
            vmem_limit_bytes=32 * 1024 * 1024,
        ),
        cost_estimate=pl.CostEstimate(
            flops=flops, transcendentals=0, bytes_accessed=bytes_accessed
        ),
    )(x, w0b, b0f, w1b, b1f, w2b, b2f)

    return out[:batch]


def init_qnetwork_params(key, state_size, action_size, num_blocks=3, default_size=64):
    """Deterministic init mimicking PyTorch nn.Linear default (uniform +-1/sqrt(fan_in)).

    Weights are stored as (in_features, out_features); biases as (1, out_features).
    """
    sizes = [state_size]
    sizes.extend(
        [default_size if i != num_blocks - 1 else action_size for i in range(num_blocks)]
    )
    params = []
    for block in range(num_blocks):
        fan_in, fan_out = sizes[block], sizes[block + 1]
        key, wk, bk = jax.random.split(key, 3)
        bound = 1.0 / jnp.sqrt(jnp.float32(fan_in))
        w = jax.random.uniform(wk, (fan_in, fan_out), jnp.float32, -bound, bound)
        b = jax.random.uniform(bk, (1, fan_out), jnp.float32, -bound, bound)
        params.extend([w, b])
    return params


def qnetwork_reference(x, w0, b0, w1, b1, w2, b2):
    """Plain-JAX reference with matching bf16-matmul / f32-accumulate numerics."""
    xb = x.astype(jnp.bfloat16)
    h = jnp.dot(xb, w0.astype(jnp.bfloat16), preferred_element_type=jnp.float32) + b0
    h = jnp.maximum(h, 0.0).astype(jnp.bfloat16)
    h = jnp.dot(h, w1.astype(jnp.bfloat16), preferred_element_type=jnp.float32) + b1
    h = jnp.maximum(h, 0.0).astype(jnp.bfloat16)
    return jnp.dot(h, w2.astype(jnp.bfloat16), preferred_element_type=jnp.float32) + b2


if __name__ == "__main__":
    state_size = 8
    action_size = 4

    key = jax.random.PRNGKey(0)
    key, xk1, xk2 = jax.random.split(key, 3)
    params = init_qnetwork_params(key, state_size, action_size)

    # Case 1: tiny batch (single grid step, block == full batch).
    x1 = jax.random.normal(xk1, (8, state_size), dtype=jnp.float32)
    out1 = jax.block_until_ready(qnetwork_forward(x1, *params))
    ref1 = qnetwork_reference(x1, *params)
    assert out1.shape == (8, action_size)
    assert jnp.allclose(out1, ref1, atol=1e-2, rtol=1e-2)

    # Case 2: ragged batch with a multi-step grid (exercises padding + resident weights).
    x2 = jax.random.normal(xk2, (50, state_size), dtype=jnp.float32)
    out2 = jax.block_until_ready(qnetwork_forward(x2, *params, block_batch=16))
    ref2 = qnetwork_reference(x2, *params)
    assert out2.shape == (50, action_size)
    assert jnp.allclose(out2, ref2, atol=1e-2, rtol=1e-2)

    print("KERNEL_OK")
</pallas_src>

<mosaic_0001>
module attributes {stable_mosaic.version = 11 : i64} {
  func.func @_qnetwork_kernel(%arg0: i32, %arg1: memref<8x8xf32, #tpu.memory_space<vmem>>, %arg2: memref<8x64xbf16, #tpu.memory_space<vmem>>, %arg3: memref<1x64xf32, #tpu.memory_space<vmem>>, %arg4: memref<64x64xbf16, #tpu.memory_space<vmem>>, %arg5: memref<1x64xf32, #tpu.memory_space<vmem>>, %arg6: memref<64x4xbf16, #tpu.memory_space<vmem>>, %arg7: memref<1x4xf32, #tpu.memory_space<vmem>>, %arg8: memref<8x4xf32, #tpu.memory_space<vmem>>) attributes {dimension_semantics = [#tpu.dimension_semantics<parallel>], iteration_bounds = array<i64: 1>, scalar_prefetch = 0 : i64, scratch_operands = 0 : i64, tpu.core_type = #tpu.core_type<tc>, window_params = [{transform_indices = @transform_0, window_bounds = array<i64: 8, 8>}, {pipeline_mode = #tpu.pipeline_mode<synchronous>, transform_indices = @transform_1, window_bounds = array<i64: 8, 64>}, {pipeline_mode = #tpu.pipeline_mode<synchronous>, transform_indices = @transform_2, window_bounds = array<i64: 1, 64>}, {pipeline_mode = #tpu.pipeline_mode<synchronous>, transform_indices = @transform_3, window_bounds = array<i64: 64, 64>}, {pipeline_mode = #tpu.pipeline_mode<synchronous>, transform_indices = @transform_4, window_bounds = array<i64: 1, 64>}, {pipeline_mode = #tpu.pipeline_mode<synchronous>, transform_indices = @transform_5, window_bounds = array<i64: 64, 4>}, {pipeline_mode = #tpu.pipeline_mode<synchronous>, transform_indices = @transform_6, window_bounds = array<i64: 1, 4>}, {transform_indices = @transform_7, window_bounds = array<i64: 8, 4>}]} {
    %c0 = arith.constant 0 : index
    %c0_0 = arith.constant 0 : index
    %0 = vector.load %arg1[%c0, %c0_0] : memref<8x8xf32, #tpu.memory_space<vmem>>, vector<8x8xf32>
    %1 = arith.truncf %0 : vector<8x8xf32> to vector<8x8xbf16>
    %c0_1 = arith.constant 0 : index
    %c0_2 = arith.constant 0 : index
    %2 = vector.load %arg2[%c0_1, %c0_2] : memref<8x64xbf16, #tpu.memory_space<vmem>>, vector<8x64xbf16>
    %cst = arith.constant dense<0.000000e+00> : vector<8x64xf32>
    %3 = tpu.matmul %1, %2, %cst {dimension_numbers = #tpu.dot_dimension_numbers<[1], [0], [0], [1], [0, 0, 1, 1], [], []>} : vector<8x8xbf16>, vector<8x64xbf16>, vector<8x64xf32> -> vector<8x64xf32>
    %c0_3 = arith.constant 0 : index
    %c0_4 = arith.constant 0 : index
    %4 = vector.load %arg3[%c0_3, %c0_4] : memref<1x64xf32, #tpu.memory_space<vmem>>, vector<1x64xf32>
    %5 = vector.broadcast %4 : vector<1x64xf32> to vector<8x64xf32>
    %6 = arith.addf %3, %5 : vector<8x64xf32>
    %cst_5 = arith.constant 0.000000e+00 : f32
    %7 = vector.broadcast %cst_5 : f32 to vector<8x64xf32>
    %8 = arith.maximumf %6, %7 : vector<8x64xf32>
    %9 = arith.truncf %8 : vector<8x64xf32> to vector<8x64xbf16>
    %c0_6 = arith.constant 0 : index
    %c0_7 = arith.constant 0 : index
    %10 = vector.load %arg4[%c0_6, %c0_7] : memref<64x64xbf16, #tpu.memory_space<vmem>>, vector<64x64xbf16>
    %cst_8 = arith.constant dense<0.000000e+00> : vector<8x64xf32>
    %11 = tpu.matmul %9, %10, %cst_8 {dimension_numbers = #tpu.dot_dimension_numbers<[1], [0], [0], [1], [0, 0, 1, 1], [], []>} : vector<8x64xbf16>, vector<64x64xbf16>, vector<8x64xf32> -> vector<8x64xf32>
    %c0_9 = arith.constant 0 : index
    %c0_10 = arith.constant 0 : index
    %12 = vector.load %arg5[%c0_9, %c0_10] : memref<1x64xf32, #tpu.memory_space<vmem>>, vector<1x64xf32>
    %13 = vector.broadcast %12 : vector<1x64xf32> to vector<8x64xf32>
    %14 = arith.addf %11, %13 : vector<8x64xf32>
    %cst_11 = arith.constant 0.000000e+00 : f32
    %15 = vector.broadcast %cst_11 : f32 to vector<8x64xf32>
    %16 = arith.maximumf %14, %15 : vector<8x64xf32>
    %17 = arith.truncf %16 : vector<8x64xf32> to vector<8x64xbf16>
    %c0_12 = arith.constant 0 : index
    %c0_13 = arith.constant 0 : index
    %18 = vector.load %arg6[%c0_12, %c0_13] : memref<64x4xbf16, #tpu.memory_space<vmem>>, vector<64x4xbf16>
    %cst_14 = arith.constant dense<0.000000e+00> : vector<8x4xf32>
    %19 = tpu.matmul %17, %18, %cst_14 {dimension_numbers = #tpu.dot_dimension_numbers<[1], [0], [0], [1], [0, 0, 1, 1], [], []>} : vector<8x64xbf16>, vector<64x4xbf16>, vector<8x4xf32> -> vector<8x4xf32>
    %c0_15 = arith.constant 0 : index
    %c0_16 = arith.constant 0 : index
    %20 = vector.load %arg7[%c0_15, %c0_16] : memref<1x4xf32, #tpu.memory_space<vmem>>, vector<1x4xf32>
    %21 = vector.broadcast %20 : vector<1x4xf32> to vector<8x4xf32>
    %22 = arith.addf %19, %21 : vector<8x4xf32>
    %c0_17 = arith.constant 0 : index
    %c0_18 = arith.constant 0 : index
    %23 = vector.load %arg8[%c0_17, %c0_18] : memref<8x4xf32, #tpu.memory_space<vmem>>, vector<8x4xf32>
    tpu.vector_store %arg8[%c0_17, %c0_18], %22 {strides = array<i32>} : memref<8x4xf32, #tpu.memory_space<vmem>>, vector<8x4xf32>,
    return
  }
  func.func @transform_0(%arg0: i32) -> (i32, i32) {
    %c0_i32 = arith.constant 0 : i32
    %c0_i32_0 = arith.constant 0 : i32
    return %arg0, %c0_i32 : i32, i32
  }
  func.func @transform_1(%arg0: i32) -> (i32, i32) {
    %c0_i32 = arith.constant 0 : i32
    %c0_i32_0 = arith.constant 0 : i32
    %c0_i32_1 = arith.constant 0 : i32
    return %c0_i32, %c0_i32_0 : i32, i32
  }
  func.func @transform_2(%arg0: i32) -> (i32, i32) {
    %c0_i32 = arith.constant 0 : i32
    %c0_i32_0 = arith.constant 0 : i32
    %c0_i32_1 = arith.constant 0 : i32
    return %c0_i32, %c0_i32_0 : i32, i32
  }
  func.func @transform_3(%arg0: i32) -> (i32, i32) {
    %c0_i32 = arith.constant 0 : i32
    %c0_i32_0 = arith.constant 0 : i32
    %c0_i32_1 = arith.constant 0 : i32
    return %c0_i32, %c0_i32_0 : i32, i32
  }
  func.func @transform_4(%arg0: i32) -> (i32, i32) {
    %c0_i32 = arith.constant 0 : i32
    %c0_i32_0 = arith.constant 0 : i32
    %c0_i32_1 = arith.constant 0 : i32
    return %c0_i32, %c0_i32_0 : i32, i32
  }
  func.func @transform_5(%arg0: i32) -> (i32, i32) {
    %c0_i32 = arith.constant 0 : i32
    %c0_i32_0 = arith.constant 0 : i32
    %c0_i32_1 = arith.constant 0 : i32
    return %c0_i32, %c0_i32_0 : i32, i32
  }
  func.func @transform_6(%arg0: i32) -> (i32, i32) {
    %c0_i32 = arith.constant 0 : i32
    %c0_i32_0 = arith.constant 0 : i32
    %c0_i32_1 = arith.constant 0 : i32
    return %c0_i32, %c0_i32_0 : i32, i32
  }
  func.func @transform_7(%arg0: i32) -> (i32, i32) {
    %c0_i32 = arith.constant 0 : i32
    %c0_i32_0 = arith.constant 0 : i32
    return %arg0, %c0_i32 : i32, i32
  }
}

</mosaic_0001>

<bundles_post_ra>
// kernel: qnetwork_forward.1
= control target key start
LH: loop header
LB: loop body
LE: loop exit
PB: predicated region body
PF: predicated region fallthrough
CT: control target
= control target key end

     0   :  { %vm41_vm0 = vcmask 1043456   ;;  %v326_v0 = vmov 0.0   ;;  %vm327_vm1 = vmmov 0   ;;  %vm37_vm2 = vcmask 64512   ;;  %s412_s1 = inlined_call_operand.vmem [shape: bf16[8,64], index: 1, kind: input, shape index: {}]   ;;  %s413_s0 = inlined_call_operand.vmem [shape: f32[8,8], index: 0, kind: input, shape index: {}]   ;;  %s414_s3 = inlined_call_operand.vmem [shape: bf16[64,64], index: 3, kind: input, shape index: {}]   ;;  %s415_s5 = inlined_call_operand.vmem [shape: bf16[64,4], index: 5, kind: input, shape index: {}]   ;;  %s416_s2 = inlined_call_operand.vmem [shape: f32[1,64], index: 2, kind: input, shape index: {}]   ;;  %s417_s4 = inlined_call_operand.vmem [shape: f32[1,64], index: 4, kind: input, shape index: {}]   ;;  %s418_s6 = inlined_call_operand.vmem [shape: f32[1,4], index: 6, kind: input, shape index: {}]   ;;  %s419_s7 = inlined_call_operand.vmem [shape: f32[8,4], index: 7, kind: output, shape index: {}]  }
   0x1   :  { %286 = vmatprep.subr.bf16.mxu0 %v326_v0  ;;  %v29_v1 = vld [vmem:[%s412_s1] sm:$0xf]  ;;  %288 = vmatprep.mubr.msk.bf16.mxu0 %vm327_vm1, %v326_v0  ;;  %v319_v6 = vld [vmem:[%s414_s3 + $0x8] sm:$0xff]   ;;  %v320_v7 = vld [vmem:[%s414_s3 + $0x10] sm:$0xff]   ;;  %vm126_vm3 = vcmask 523264   ;;  %vm254_vm4 = vcmask 31744  }
   0x2   :  { %v27_v2 = vld [vmem:[%s413_s0] sm:$0xff]  ;;  %v43_v3 = vsel %vm41_vm0, %v29_v1, 0  ;;  %292 = vmatprep.subr.bf16.mxu1 %v326_v0  ;;  %300 = vmatprep.mubr.msk.bf16.mxu1 %vm327_vm1, %v326_v0  ;;  %v321_v8 = vld [vmem:[%s414_s3 + $0x18] sm:$0xff]   ;;  %v323_v10 = vld [vmem:[%s415_s5 + $0x8] sm:$0xff]  }
   0x3   :  { %v28_v4 = vpack.c.bf16 %v27_v2, %v27_v2  ;;  %v318_v5 = vld [vmem:[%s414_s3] sm:$0xff]   ;;  %287 = vmatpush3.bf16.msra.mxu0 %v43_v3  ;;  %v324_v19 = vld [vmem:[%s415_s5 + $0x10] sm:$0xff]   ;;  %v325_v20 = vld [vmem:[%s415_s5 + $0x18] sm:$0xff]  }
   0x4   :  { %293 = vmatpush3.bf16.msra.mxu1 %v318_v5  ;;  %304 = vmatprep.subr.bf16.mxu0 %v326_v0  ;;  %v322_v9 = vld [vmem:[%s415_s5] sm:$0xff]  }
   0x5   :  { %294 = vmatprep.subr.bf16.mxu1 %v326_v0  ;;  %v260_v11 = vld [vmem:[%s416_s2] ss:$0 sm:$0xff] }
   0x6   :  { %289 = vmatmul.mubr.msk.bf16.vlgmr.msra.gmra.mrb[0].mxu0 %vm37_vm2, %v28_v4  ;;  %v262_v21 = vld [vmem:[%s417_s4] ss:$0 sm:$0xff] }
   0x7   :  { %312 = vmatprep.mubr.msk.bf16.mxu0 %vm327_vm1, %v326_v0  ;;  %305 = vmatpush3.bf16.msra.mxu0 %v322_v9  ;;  %v268_v29 = vld [vmem:[%s418_s6] ss:$0 sm:$0xff] }
   0x8   :  { %295 = vmatpush3.bf16.msra.mxu1 %v319_v6  ;;  %306 = vmatprep.subr.bf16.mxu0 %v326_v0 }
   0x9   :  { %296 = vmatprep.subr.bf16.mxu1 %v326_v0 }
   0xb   :  { %307 = vmatpush3.bf16.msra.mxu0 %v323_v10 }
   0xc   :  { %297 = vmatpush3.bf16.msra.mxu1 %v320_v7  ;;  %308 = vmatprep.subr.bf16.mxu0 %v326_v0 }
   0xd   :  { %298 = vmatprep.subr.bf16.mxu1 %v326_v0 }
   0xf   :  { %309 = vmatpush3.bf16.msra.mxu0 %v324_v19 }
  0x10   :  { %299 = vmatpush3.bf16.msra.mxu1 %v321_v8  ;;  %310 = vmatprep.subr.bf16.mxu0 %v326_v0 }
  0x13   :  { %311 = vmatpush3.bf16.msra.mxu0 %v325_v20 }
  0xd9   :  { %v79_v12 = vpop.f32.mrb[0].mxu0 }
  0xda   :  { %v80_v13 = vadd.f32 %v260_v11, %v79_v12  ;;  %v290_v14 = vpop.f32.mrb[1].mxu0 }
  0xdb   :  { %v82_v15 = vpop.f32.mrb[2].mxu0 }
  0xdc   :  { %v85_v16 = vmax.f32 %v80_v13, 0.0  ;;  %v291_v17 = vpop.f32.mrb[3].mxu0 }
  0xde   :  { %v86_v18 = vpack.c.bf16 %v85_v16, %v85_v16 }
  0xe0   :  { %301 = vmatmul.mubr.msk.bf16.vlgmr.msra.gmra.mrb[0].mxu1 %vm126_vm3, %v86_v18 }
 0x1b3   :  { %v164_v22 = vpop.f32.mrb[0].mxu1 }
 0x1b4   :  { %v165_v23 = vadd.f32 %v262_v21, %v164_v22  ;;  %v302_v24 = vpop.f32.mrb[1].mxu1 }
 0x1b5   :  { %v167_v25 = vpop.f32.mrb[2].mxu1 }
 0x1b6   :  { %v170_v26 = vmax.f32 %v165_v23, 0.0  ;;  %v303_v27 = vpop.f32.mrb[3].mxu1 }
 0x1b8   :  { %v171_v28 = vpack.c.bf16 %v170_v26, %v170_v26 }
 0x1ba   :  { %313 = vmatmul.mubr.msk.bf16.vlgmr.msra.gmra.mrb[4].mxu0 %vm126_vm3, %v171_v28 }
 0x28d   :  { %v248_v30 = vpop.f32.mrb[4].mxu0 }
 0x28e   :  { %v249_v31 = vadd.f32 %v268_v29, %v248_v30  ;;  %v314_v32 = vpop.f32.mrb[5].mxu0 }
 0x28f   :  { %v251_v33 = vpop.f32.mrb[6].mxu0 }
 0x290   :  { %255 = vst.msk [vmem:[%s419_s7] sm:$0xff] %vm254_vm4, %v249_v31  ;;  %v315_v34 = vpop.f32.mrb[7].mxu0 }

</bundles_post_ra>
